<compile_context>
chip_gen: v5e
topology: v5e:2x2
jax: 0.10.0
libtpu: 0.0.40
codegen_flags: <defaults>
</compile_context>

<pallas_src>
import jax
import jax.numpy as jnp
from jax.experimental import pallas as pl
from jax.experimental.pallas import tpu as pltpu


def _round_up(v, m):
    return (v + m - 1) // m * m


# ---------------------------------------------------------------------------
# Pallas kernel: fused fc1 + fc2 (bf16 MXU, f32 accumulation)
# ---------------------------------------------------------------------------
def _excint_kernel(x_ref, w1_ref, b1_ref, w2_ref, b2_ref, out_ref):
    # x_ref  : (bn, k_pad)   bf16 row tile of the flattened (zero-K-padded) input
    # w1_ref : (k_pad, mid)  bf16 fc1 weight, (in, out) layout
    # b1_ref : (1, mid)      f32
    # w2_ref : (mid, out)    bf16 fc2 weight, (in, out) layout
    # b2_ref : (1, out)      f32
    # out_ref: (bn, out)
    h = jnp.dot(x_ref[...], w1_ref[...], preferred_element_type=jnp.float32)
    h = h + b1_ref[...]                      # f32 bias add on the VPU
    # Intermediate stays resident in vregs/VMEM; second matmul feeds off it
    # directly (cast to bf16 for the MXU, accumulate in f32).
    y = jnp.dot(h.astype(w2_ref.dtype), w2_ref[...],
                preferred_element_type=jnp.float32)
    y = y + b2_ref[...]
    out_ref[...] = y.astype(out_ref.dtype)


# ---------------------------------------------------------------------------
# Wrapper
# ---------------------------------------------------------------------------
def excint_forward(x, w1_io, b1, w2_io, b2, *, block_n=512,
                   vmem_budget_bytes=44 * 1024 * 1024):
    """EXCINT.forward: x (N, C, H) -> (N, out_channel).

    w1_io: (in_channel, mid_channel)   (PyTorch fc1.weight.T)
    w2_io: (mid_channel, out_channel)  (PyTorch fc2.weight.T)
    b1:    (mid_channel,), b2: (out_channel,)
    """
    N = x.shape[0]
    x2 = x.reshape(N, -1)                      # the module's x.view(N, -1)
    in_ch = x2.shape[1]
    mid = w1_io.shape[1]
    out = w2_io.shape[1]
    assert w1_io.shape[0] == in_ch and w2_io.shape[0] == mid
    out_dtype = x.dtype
    out_bytes = jnp.dtype(out_dtype).itemsize

    # --- Zero-pad the reduction dim (K) to a multiple of 128 (lane-dense x
    #     loads, full MXU systolic depth). Zero rows/cols contribute exactly 0.
    k_pad = _round_up(in_ch, 128)
    if k_pad != in_ch:
        x2 = jnp.pad(x2, ((0, 0), (0, k_pad - in_ch)))
        w1_io = jnp.pad(w1_io, ((0, k_pad - in_ch), (0, 0)))

    # --- bf16 MXU path (accumulation stays f32 inside the kernel).
    x2 = x2.astype(jnp.bfloat16)
    w1b = w1_io.astype(jnp.bfloat16)
    w2b = w2_io.astype(jnp.bfloat16)
    b1r = b1.reshape(1, mid).astype(jnp.float32)
    b2r = b2.reshape(1, out).astype(jnp.float32)

    # --- Batch tile selection.
    #     Large tiles amortize ~0.35us/step overhead; cap so the grid has >= 2
    #     steps when N allows (v7x megacore) and so everything fits the VMEM
    #     budget (v7x has only 64 MiB physical).
    bn = min(block_n, max(8, _round_up(pl.cdiv(N, 2), 8)))

    def _vmem_bytes(bn_):
        return (2 * bn_ * k_pad * 2                    # x tile (bf16, 2 bufs)
                + 2 * bn_ * out * out_bytes            # out tile (2 bufs)
                + 2 * (k_pad * mid + mid * out) * 2    # w1, w2 (bf16, 2 bufs)
                + 2 * (mid + out) * 4                  # biases (f32, 2 bufs)
                + bn_ * mid * 4)                       # f32 fc1 intermediate
    while bn > 8 and _vmem_bytes(bn) > vmem_budget_bytes:
        bn = max(8, _round_up(bn // 2, 8))

    grid = (pl.cdiv(N, bn),)

    # --- Advisory cost estimate for XLA's scheduler.
    flops = 2 * N * (k_pad * mid + mid * out)
    bytes_accessed = (N * k_pad * 2 + k_pad * mid * 2 + mid * out * 2
                      + (mid + out) * 4 + N * out * out_bytes)
    cost = pl.CostEstimate(flops=flops, transcendentals=0,
                           bytes_accessed=bytes_accessed)

    y = pl.pallas_call(
        _excint_kernel,
        out_shape=jax.ShapeDtypeStruct((N, out), out_dtype),
        grid=grid,
        in_specs=[
            pl.BlockSpec((bn, k_pad), lambda i: (i, 0)),    # x rows (streamed)
            pl.BlockSpec((k_pad, mid), lambda i: (0, 0)),   # w1 (grid-invariant)
            pl.BlockSpec((1, mid), lambda i: (0, 0)),       # b1 (grid-invariant)
            pl.BlockSpec((mid, out), lambda i: (0, 0)),     # w2 (grid-invariant)
            pl.BlockSpec((1, out), lambda i: (0, 0)),       # b2 (grid-invariant)
        ],
        out_specs=pl.BlockSpec((bn, out), lambda i: (i, 0)),
        compiler_params=pltpu.CompilerParams(
            dimension_semantics=("parallel",),
            vmem_limit_bytes=56 * 1024 * 1024),
        cost_estimate=cost,
    )(x2, w1b, b1r, w2b, b2r)

    return y


# ---------------------------------------------------------------------------
# Pure-JAX reference (PyTorch Linear semantics: y = x @ W.T + b), f32
# ---------------------------------------------------------------------------
def _ref_forward(x, w1_pt, b1, w2_pt, b2):
    N = x.shape[0]
    xf = x.reshape(N, -1)
    h = xf @ w1_pt.T + b1
    return h @ w2_pt.T + b2


# ---------------------------------------------------------------------------
# Main
# ---------------------------------------------------------------------------
if __name__ == "__main__":
    # Small shapes consistent with the module: x (N, C, H), in_channel = C*H.
    # mid/out = 256 keeps the 256-wide v6e/v7x MXU columns fully utilized.
    N, C, H = 2, 4, 16
    in_channel = C * H            # 64 (zero-padded to 128 inside the wrapper)
    mid_channel = 256
    out_channel = 256

    key = jax.random.PRNGKey(0)
    k_x, k_w1, k_b1, k_w2, k_b2 = jax.random.split(key, 5)

    x = jax.random.normal(k_x, (N, C, H), jnp.float32)

    # PyTorch nn.Linear weights are (out_features, in_features).
    w1_pt = jax.random.normal(k_w1, (mid_channel, in_channel), jnp.float32) * 0.1
    b1 = jax.random.normal(k_b1, (mid_channel,), jnp.float32) * 0.1
    w2_pt = jax.random.normal(k_w2, (out_channel, mid_channel), jnp.float32) * 0.1
    b2 = jax.random.normal(k_b2, (out_channel,), jnp.float32) * 0.1

    # Transpose once on the host side to the kernel's (in, out) layout.
    w1_io = jnp.transpose(w1_pt)
    w2_io = jnp.transpose(w2_pt)

    out = jax.block_until_ready(excint_forward(x, w1_io, b1, w2_io, b2))
    ref = jax.block_until_ready(_ref_forward(x, w1_pt, b1, w2_pt, b2))

    assert out.shape == (N, out_channel), out.shape
    # bf16 inputs on the MXU (f32 accumulation) => looser tolerance vs f32 ref.
    max_err = float(jnp.max(jnp.abs(out - ref)))
    assert jnp.allclose(out, ref, rtol=5e-2, atol=5e-2), max_err

    print("KERNEL_OK")
</pallas_src>

<mosaic_0001>
module attributes {stable_mosaic.version = 11 : i64} {
  func.func @_excint_kernel(%arg0: i32, %arg1: memref<8x128xbf16, #tpu.memory_space<vmem>>, %arg2: memref<128x256xbf16, #tpu.memory_space<vmem>>, %arg3: memref<1x256xf32, #tpu.memory_space<vmem>>, %arg4: memref<256x256xbf16, #tpu.memory_space<vmem>>, %arg5: memref<1x256xf32, #tpu.memory_space<vmem>>, %arg6: memref<8x256xf32, #tpu.memory_space<vmem>>) attributes {dimension_semantics = [#tpu.dimension_semantics<parallel>], iteration_bounds = array<i64: 1>, scalar_prefetch = 0 : i64, scratch_operands = 0 : i64, tpu.core_type = #tpu.core_type<tc>, window_params = [{transform_indices = @transform_0, window_bounds = array<i64: 8, 128>}, {pipeline_mode = #tpu.pipeline_mode<synchronous>, transform_indices = @transform_1, window_bounds = array<i64: 128, 256>}, {pipeline_mode = #tpu.pipeline_mode<synchronous>, transform_indices = @transform_2, window_bounds = array<i64: 1, 256>}, {pipeline_mode = #tpu.pipeline_mode<synchronous>, transform_indices = @transform_3, window_bounds = array<i64: 256, 256>}, {pipeline_mode = #tpu.pipeline_mode<synchronous>, transform_indices = @transform_4, window_bounds = array<i64: 1, 256>}, {transform_indices = @transform_5, window_bounds = array<i64: 8, 256>}]} {
    %c0 = arith.constant 0 : index
    %c0_0 = arith.constant 0 : index
    %0 = vector.load %arg1[%c0, %c0_0] : memref<8x128xbf16, #tpu.memory_space<vmem>>, vector<8x128xbf16>
    %c0_1 = arith.constant 0 : index
    %c0_2 = arith.constant 0 : index
    %1 = vector.load %arg2[%c0_1, %c0_2] : memref<128x256xbf16, #tpu.memory_space<vmem>>, vector<128x256xbf16>
    %cst = arith.constant dense<0.000000e+00> : vector<8x256xf32>
    %2 = tpu.matmul %0, %1, %cst {dimension_numbers = #tpu.dot_dimension_numbers<[1], [0], [0], [1], [0, 0, 1, 1], [], []>} : vector<8x128xbf16>, vector<128x256xbf16>, vector<8x256xf32> -> vector<8x256xf32>
    %c0_3 = arith.constant 0 : index
    %c0_4 = arith.constant 0 : index
    %3 = vector.load %arg3[%c0_3, %c0_4] : memref<1x256xf32, #tpu.memory_space<vmem>>, vector<1x256xf32>
    %4 = vector.broadcast %3 : vector<1x256xf32> to vector<8x256xf32>
    %5 = arith.addf %2, %4 : vector<8x256xf32>
    %6 = arith.truncf %5 : vector<8x256xf32> to vector<8x256xbf16>
    %c0_5 = arith.constant 0 : index
    %c0_6 = arith.constant 0 : index
    %7 = vector.load %arg4[%c0_5, %c0_6] : memref<256x256xbf16, #tpu.memory_space<vmem>>, vector<256x256xbf16>
    %cst_7 = arith.constant dense<0.000000e+00> : vector<8x256xf32>
    %8 = tpu.matmul %6, %7, %cst_7 {dimension_numbers = #tpu.dot_dimension_numbers<[1], [0], [0], [1], [0, 0, 1, 1], [], []>} : vector<8x256xbf16>, vector<256x256xbf16>, vector<8x256xf32> -> vector<8x256xf32>
    %c0_8 = arith.constant 0 : index
    %c0_9 = arith.constant 0 : index
    %9 = vector.load %arg5[%c0_8, %c0_9] : memref<1x256xf32, #tpu.memory_space<vmem>>, vector<1x256xf32>
    %10 = vector.broadcast %9 : vector<1x256xf32> to vector<8x256xf32>
    %11 = arith.addf %8, %10 : vector<8x256xf32>
    %c0_10 = arith.constant 0 : index
    %c0_11 = arith.constant 0 : index
    %12 = vector.load %arg6[%c0_10, %c0_11] : memref<8x256xf32, #tpu.memory_space<vmem>>, vector<8x256xf32>
    tpu.vector_store %arg6[%c0_10, %c0_11], %11 {strides = array<i32>} : memref<8x256xf32, #tpu.memory_space<vmem>>, vector<8x256xf32>,
    return
  }
  func.func @transform_0(%arg0: i32) -> (i32, i32) {
    %c0_i32 = arith.constant 0 : i32
    %c0_i32_0 = arith.constant 0 : i32
    return %arg0, %c0_i32 : i32, i32
  }
  func.func @transform_1(%arg0: i32) -> (i32, i32) {
    %c0_i32 = arith.constant 0 : i32
    %c0_i32_0 = arith.constant 0 : i32
    %c0_i32_1 = arith.constant 0 : i32
    return %c0_i32, %c0_i32_0 : i32, i32
  }
  func.func @transform_2(%arg0: i32) -> (i32, i32) {
    %c0_i32 = arith.constant 0 : i32
    %c0_i32_0 = arith.constant 0 : i32
    %c0_i32_1 = arith.constant 0 : i32
    return %c0_i32, %c0_i32_0 : i32, i32
  }
  func.func @transform_3(%arg0: i32) -> (i32, i32) {
    %c0_i32 = arith.constant 0 : i32
    %c0_i32_0 = arith.constant 0 : i32
    %c0_i32_1 = arith.constant 0 : i32
    return %c0_i32, %c0_i32_0 : i32, i32
  }
  func.func @transform_4(%arg0: i32) -> (i32, i32) {
    %c0_i32 = arith.constant 0 : i32
    %c0_i32_0 = arith.constant 0 : i32
    %c0_i32_1 = arith.constant 0 : i32
    return %c0_i32, %c0_i32_0 : i32, i32
  }
  func.func @transform_5(%arg0: i32) -> (i32, i32) {
    %c0_i32 = arith.constant 0 : i32
    %c0_i32_0 = arith.constant 0 : i32
    return %arg0, %c0_i32 : i32, i32
  }
}

</mosaic_0001>

<bundles_post_ra>
// kernel: tpu_custom_call.1
= control target key start
LH: loop header
LB: loop body
LE: loop exit
PB: predicated region body
PF: predicated region fallthrough
CT: control target
= control target key end

     0   :  { %10 = vsyncpa [#allocation3], 0  ;;  %s960_s0 = inlined_call_operand.hbm [shape: bf16[2,128], index: 0, kind: input, shape index: {}]   ;;  %s961_s1 = inlined_call_operand.hbm [shape: bf16[128,256], index: 1, kind: input, shape index: {}]   ;;  %s962_s2 = inlined_call_operand.hbm [shape: f32[1,256], index: 2, kind: input, shape index: {}]   ;;  %s963_s3 = inlined_call_operand.hbm [shape: bf16[256,256], index: 3, kind: input, shape index: {}]   ;;  %s964_s4 = inlined_call_operand.vmem [shape: f32[1,256], index: 4, kind: input, shape index: {}]   ;;  %s965_s5 = inlined_call_operand.hbm [shape: f32[2,256], index: 5, kind: output, shape index: {}]  }
   0x1   :  { %11 = vsyncpa [#allocation6], 0 }
   0x2   :  { %12 = vsyncpa [#allocation9], 0 }
   0x3   :  { %13 = vsyncpa [#allocation4], 0  ;;  %s31_s20 = sshll.u32 %s961_s1, 4  ;;  %s32_s20 = int_to_ptr.hbm [resolvable:$true] %s31_s20 }
   0x4   :  { %17 = vsyncadd [#allocation3], 48  ;;  %s901_s21 = smov [#allocation5]   ;;  %s18_s25 = sshll.u32 %s960_s0, 4  ;;  %s19_s25 = int_to_ptr.hbm [resolvable:$true] %s18_s25 }
   0x5   :  { %s33_s22 = sshll.u32 %s901_s21, 4  ;;  %s902_s26 = smov 128   ;;  %s34_s22 = int_to_ptr.vmem [resolvable:$true] %s33_s22 }
   0x6   :  { %s903_s27 = smov 8   ;;  %s904_s28 = smov [#allocation2]  }
   0x7   :  { %39 = dma.hbm_to_vmem [thread:$0]  %s32_s20, 2048, %s34_s22, [#allocation6], %s902_s26, %s902_s26, %s903_s27  }
   0x8   :  { %s20_s29 = sshll.u32 %s904_s28, 4  ;;  %s905_s30 = smov 16   ;;  %s21_s29 = int_to_ptr.vmem [resolvable:$true] %s20_s29 }
   0x9   :  { %s906_s6 = smov 1   ;;  %s45_s8 = sshll.u32 %s962_s2, 4  ;;  %s46_s8 = int_to_ptr.hbm [resolvable:$true] %s45_s8 }
   0xa   :  { %26 = dma.hbm_to_vmem [thread:$0]  %s19_s25, 16, %s21_s29, [#allocation3], %s905_s30, %s905_s30, %s906_s6  }
   0xb   :  { %s907_s9 = smov [#allocation7]   ;;  %s55_s12 = sshll.u32 %s963_s3, 4  ;;  %s56_s12 = int_to_ptr.hbm [resolvable:$true] %s55_s12 }
   0xc   :  { %s47_s10 = sshll.u32 %s907_s9, 4  ;;  %s908_s13 = smov [#allocation8]   ;;  %s48_s10 = int_to_ptr.vmem [resolvable:$true] %s47_s10 }
   0xd   :  { %50 = dma.hbm_to_vmem [thread:$0]  %s46_s8, 32, %s48_s10, [#allocation6]  }
   0xe   :  { %s57_s14 = sshll.u32 %s908_s13, 4  ;;  %s58_s14 = int_to_ptr.vmem [resolvable:$true] %s57_s14 }
   0xf   :  { %63 = dma.hbm_to_vmem [thread:$0]  %s56_s12, 4096, %s58_s14, [#allocation9], %s902_s26, %s902_s26, %s903_s27  }
  0x10   :  { %893 = dma.done.wait [#allocation3], 64  }
  0x11   :  { %894 = vsyncadd [#allocation3], 4294967232 }
  0x12   :  { %895 = dma.done.wait [#allocation6], 2080  }
  0x13   :  { %896 = vsyncadd [#allocation6], 4294965216 }
  0x14   :  { %897 = dma.done.wait [#allocation9], 4096  }
  0x15   :  { %898 = vsyncadd [#allocation9], 4294963200  ;;  %v580_v0 = vld [vmem:[#allocation5 + $0x70] sm:$0xf]  ;;  %v729_v1 = vld [vmem:[#allocation5 + $0x74] sm:$0xf0] }
  0x16   :  { %v728_v2 = vld [vmem:[#allocation5 + $0x74] sm:$0xf]  ;;  %v581_v3 = vor.u32 %v729_v1, %v580_v0  ;;  %v582_v4 = vld [vmem:[#allocation5 + $0x78] sm:$0xf0]  ;;  %v572_v5 = vld [vmem:[#allocation5 + $0x60] sm:$0xf] }
  0x17   :  { %v727_v6 = vld [vmem:[#allocation5 + $0x64] sm:$0xf0]  ;;  %v585_v7 = vor.u32 %v728_v2, %v582_v4  ;;  %v726_v8 = vld [vmem:[#allocation5 + $0x64] sm:$0xf]  ;;  %v574_v9 = vld [vmem:[#allocation5 + $0x68] sm:$0xf0] }
  0x18   :  { %201 = vmatpush.bf16.msra.mxu0 %v581_v3  ;;  %v573_v10 = vor.u32 %v727_v6, %v572_v5  ;;  %v577_v11 = vor.u32 %v726_v8, %v574_v9  ;;  %v564_v12 = vld [vmem:[#allocation5 + $0x50] sm:$0xf]  ;;  %v725_v13 = vld [vmem:[#allocation5 + $0x54] sm:$0xf0]  ;;  %v724_v14 = vld [vmem:[#allocation5 + $0x54] sm:$0xf] }
  0x19   :  { %214 = vmatpush.bf16.msra.mxu1 %v585_v7  ;;  %v566_v15 = vld [vmem:[#allocation5 + $0x58] sm:$0xf0]  ;;  %v565_v16 = vor.u32 %v725_v13, %v564_v12  ;;  %v556_v18 = vld [vmem:[#allocation5 + $0x40] sm:$0xf]  ;;  %v723_v19 = vld [vmem:[#allocation5 + $0x44] sm:$0xf0] }
  0x1a   :  { %v569_v17 = vor.u32 %v724_v14, %v566_v15  ;;  %v722_v20 = vld [vmem:[#allocation5 + $0x44] sm:$0xf]  ;;  %v558_v21 = vld [vmem:[#allocation5 + $0x48] sm:$0xf0]  ;;  %v548_v22 = vld [vmem:[#allocation5 + $0x30] sm:$0xf]  ;;  %v557_v25 = vor.u32 %v723_v19, %v556_v18 }
  0x1b   :  { %v721_v23 = vld [vmem:[#allocation5 + $0x34] sm:$0xf0]  ;;  %v82_v24 = vld [vmem:[#allocation2] sm:$0x1]  ;;  %v720_v26 = vld [vmem:[#allocation5 + $0x34] sm:$0xf]  ;;  %v561_v31 = vor.u32 %v722_v20, %v558_v21 }
  0x1c   :  { %202 = vmatpush.bf16.msra.mxu0 %v573_v10  ;;  %v550_v27 = vld [vmem:[#allocation5 + $0x38] sm:$0xf0]  ;;  %109 = vst [vmem:[#allocation1] ss:$9 sm:$0xff] %v82_v24  ;;  %v644_v32 = vld [vmem:[#allocation8 + $0x70] sm:$0xf]  ;;  %v549_v38 = vor.u32 %v721_v23, %v548_v22 }
  0x1d   :  { %215 = vmatpush.bf16.msra.mxu1 %v577_v11  ;;  %v83_v28 = vld [vmem:[#allocation2 + $0x1] sm:$0x1]  ;;  %v84_v29 = vld [vmem:[#allocation2 + $0x2] sm:$0x1]  ;;  %v85_v30 = vld [vmem:[#allocation2 + $0x3] sm:$0x1]  ;;  %v553_v41 = vor.u32 %v720_v26, %v550_v27 }
  0x1e   :  { %v745_v33 = vld [vmem:[#allocation8 + $0x74] sm:$0xf0]  ;;  %112 = vst [vmem:[#allocation1 + $0x1] ss:$9 sm:$0xff] %v83_v28  ;;  %v708_v35 = vld [vmem:[#allocation8 + $0xf0] sm:$0xf] }
  0x1f   :  { %v645_v34 = vor.u32 %v745_v33, %v644_v32  ;;  %v761_v36 = vld [vmem:[#allocation8 + $0xf4] sm:$0xf0]  ;;  %115 = vst [vmem:[#allocation1 + $0x2] ss:$9 sm:$0xff] %v84_v29  ;;  %v540_v39 = vld [vmem:[#allocation5 + $0x20] sm:$0xf] }
  0x20   :  { %203 = vmatpush.bf16.msra.mxu0 %v565_v16  ;;  %v709_v37 = vor.u32 %v761_v36, %v708_v35  ;;  %v719_v40 = vld [vmem:[#allocation5 + $0x24] sm:$0xf0]  ;;  %118 = vst [vmem:[#allocation1 + $0x3] ss:$9 sm:$0xff] %v85_v30  ;;  %v636_v42 = vld [vmem:[#allocation8 + $0x60] sm:$0xf] }
  0x21   :  { %216 = vmatpush.bf16.msra.mxu1 %v569_v17  ;;  %427 = vmatpush.bf16.msra.mxu2 %v645_v34  ;;  %v743_v43 = vld [vmem:[#allocation8 + $0x64] sm:$0xf0]  ;;  %v700_v44 = vld [vmem:[#allocation8 + $0xe0] sm:$0xf]  ;;  %v628_v50 = vld [vmem:[#allocation8 + $0x50] sm:$0xf]  ;;  %v541_v51 = vor.u32 %v719_v40, %v540_v39 }
  0x22   :  { %440 = vmatpush.bf16.msra.mxu3 %v709_v37  ;;  %v718_v45 = vld [vmem:[#allocation5 + $0x24] sm:$0xf]  ;;  %v542_v46 = vld [vmem:[#allocation5 + $0x28] sm:$0xf0]  ;;  %v637_v47 = vor.u32 %v743_v43, %v636_v42  ;;  %v741_v52 = vld [vmem:[#allocation8 + $0x54] sm:$0xf0] }
  0x23   :  { %v759_v48 = vld [vmem:[#allocation8 + $0xe4] sm:$0xf0]  ;;  %v692_v53 = vld [vmem:[#allocation8 + $0xd0] sm:$0xf]  ;;  %v757_v54 = vld [vmem:[#allocation8 + $0xd4] sm:$0xf0]  ;;  %v545_v55 = vor.u32 %v718_v45, %v542_v46  ;;  %v629_v59 = vor.u32 %v741_v52, %v628_v50 }
  0x24   :  { %204 = vmatpush.bf16.msra.mxu0 %v557_v25  ;;  %v701_v49 = vor.u32 %v759_v48, %v700_v44  ;;  %v532_v56 = vld [vmem:[#allocation5 + $0x10] sm:$0xf]  ;;  %v717_v57 = vld [vmem:[#allocation5 + $0x14] sm:$0xf0]  ;;  %v716_v58 = vld [vmem:[#allocation5 + $0x14] sm:$0xf]  ;;  %v693_v60 = vor.u32 %v757_v54, %v692_v53 }
  0x25   :  { %217 = vmatpush.bf16.msra.mxu1 %v561_v31  ;;  %428 = vmatpush.bf16.msra.mxu2 %v637_v47  ;;  %v534_v61 = vld [vmem:[#allocation5 + $0x18] sm:$0xf0]  ;;  %v620_v62 = vld [vmem:[#allocation8 + $0x40] sm:$0xf]  ;;  %v739_v63 = vld [vmem:[#allocation8 + $0x44] sm:$0xf0]  ;;  %v533_v2 = vor.u32 %v717_v57, %v532_v56 }
  0x26   :  { %441 = vmatpush.bf16.msra.mxu3 %v701_v49  ;;  %v684_v0 = vld [vmem:[#allocation8 + $0xc0] sm:$0xf]  ;;  %v755_v1 = vld [vmem:[#allocation8 + $0xc4] sm:$0xf0]  ;;  %v621_v6 = vor.u32 %v739_v63, %v620_v62  ;;  %v537_v7 = vor.u32 %v716_v58, %v534_v61  ;;  %v612_v10 = vld [vmem:[#allocation8 + $0x30] sm:$0xf] }
  0x27   :  { %v524_v3 = vld [vmem:[#allocation5] sm:$0xf]  ;;  %v715_v4 = vld [vmem:[#allocation5 + $0x4] sm:$0xf0]  ;;  %v714_v5 = vld [vmem:[#allocation5 + $0x4] sm:$0xf]  ;;  %v685_v9 = vor.u32 %v755_v1, %v684_v0 }
  0x28   :  { %205 = vmatpush.bf16.msra.mxu0 %v549_v38  ;;  %v526_v8 = vld [vmem:[#allocation5 + $0x8] sm:$0xf0]  ;;  %v737_v11 = vld [vmem:[#allocation8 + $0x34] sm:$0xf0]  ;;  %v744_v12 = vld [vmem:[#allocation8 + $0x74] sm:$0xf]  ;;  %v525_v18 = vor.u32 %v715_v4, %v524_v3 }
  0x29   :  { %218 = vmatpush.bf16.msra.mxu1 %v553_v41  ;;  %429 = vmatpush.bf16.msra.mxu2 %v629_v59  ;;  %v646_v13 = vld [vmem:[#allocation8 + $0x78] sm:$0xf0]  ;;  %v760_v14 = vld [vmem:[#allocation8 + $0xf4] sm:$0xf]  ;;  %v676_v16 = vld [vmem:[#allocation8 + $0xb0] sm:$0xf]  ;;  %v613_v19 = vor.u32 %v737_v11, %v612_v10  ;;  %v529_v20 = vor.u32 %v714_v5, %v526_v8 }
  0x2a   :  { %442 = vmatpush.bf16.msra.mxu3 %v693_v60  ;;  %v710_v15 = vld [vmem:[#allocation8 + $0xf8] sm:$0xf0]  ;;  %v753_v17 = vld [vmem:[#allocation8 + $0xb4] sm:$0xf0]  ;;  %v649_v21 = vor.u32 %v744_v12, %v646_v13  ;;  %v604_v22 = vld [vmem:[#allocation8 + $0x20] sm:$0xf] }
  0x2b   :  { %v735_v23 = vld [vmem:[#allocation8 + $0x24] sm:$0xf0]  ;;  %v713_v24 = vor.u32 %v760_v14, %v710_v15  ;;  %v742_v25 = vld [vmem:[#allocation8 + $0x64] sm:$0xf]  ;;  %v638_v26 = vld [vmem:[#allocation8 + $0x68] sm:$0xf0]  ;;  %v677_v28 = vor.u32 %v753_v17, %v676_v16 }
  0x2c   :  { %206 = vmatpush.bf16.msra.mxu0 %v541_v51  ;;  %v758_v27 = vld [vmem:[#allocation8 + $0xe4] sm:$0xf]  ;;  %v702_v29 = vld [vmem:[#allocation8 + $0xe8] sm:$0xf0]  ;;  %v668_v30 = vld [vmem:[#allocation8 + $0xa0] sm:$0xf]  ;;  %v605_v33 = vor.u32 %v735_v23, %v604_v22  ;;  %v641_v34 = vor.u32 %v742_v25, %v638_v26 }
  0x2d   :  { %219 = vmatpush.bf16.msra.mxu1 %v545_v55  ;;  %430 = vmatpush.bf16.msra.mxu2 %v621_v6  ;;  %v751_v31 = vld [vmem:[#allocation8 + $0xa4] sm:$0xf0]  ;;  %v119_v32 = vld [vmem:[#allocation1] sm:$0xff]  ;;  %v705_v37 = vor.u32 %v758_v27, %v702_v29  ;;  %v630_v39 = vld [vmem:[#allocation8 + $0x58] sm:$0xf0]  ;;  %vm482_vm0 = vcmask 1041408  }
  0x2e   :  { %443 = vmatpush.bf16.msra.mxu3 %v685_v9  ;;  %v596_v35 = vld [vmem:[#allocation8 + $0x10] sm:$0xf]  ;;  %v733_v36 = vld [vmem:[#allocation8 + $0x14] sm:$0xf0]  ;;  %v740_v38 = vld [vmem:[#allocation8 + $0x54] sm:$0xf]  ;;  %v669_v41 = vor.u32 %v751_v31, %v668_v30 }
  0x2f   :  { %v756_v40 = vld [vmem:[#allocation8 + $0xd4] sm:$0xf]  ;;  %v694_v42 = vld [vmem:[#allocation8 + $0xd8] sm:$0xf0]  ;;  %v660_v43 = vld [vmem:[#allocation8 + $0x90] sm:$0xf]  ;;  %v597_v45 = vor.u32 %v733_v36, %v596_v35  ;;  %v633_v46 = vor.u32 %v740_v38, %v630_v39 }
  0x30   :  { %207 = vmatpush.bf16.msra.mxu0 %v533_v2  ;;  %v749_v44 = vld [vmem:[#allocation8 + $0x94] sm:$0xf0]  ;;  %v697_v47 = vor.u32 %v756_v40, %v694_v42  ;;  %v738_v48 = vld [vmem:[#allocation8 + $0x44] sm:$0xf]  ;;  %v622_v49 = vld [vmem:[#allocation8 + $0x48] sm:$0xf0] }
  0x31   :  { %220 = vmatpush.bf16.msra.mxu1 %v537_v7  ;;  %431 = vmatpush.bf16.msra.mxu2 %v613_v19  ;;  %v661_v50 = vor.u32 %v749_v44, %v660_v43  ;;  %v754_v51 = vld [vmem:[#allocation8 + $0xc4] sm:$0xf]  ;;  %v686_v52 = vld [vmem:[#allocation8 + $0xc8] sm:$0xf0]  ;;  %v625_v53 = vor.u32 %v738_v48, %v622_v49  ;;  %v736_v55 = vld [vmem:[#allocation8 + $0x34] sm:$0xf] }
  0x32   :  { %444 = vmatpush.bf16.msra.mxu3 %v677_v28  ;;  %v689_v54 = vor.u32 %v754_v51, %v686_v52  ;;  %v614_v56 = vld [vmem:[#allocation8 + $0x38] sm:$0xf0]  ;;  %v752_v57 = vld [vmem:[#allocation8 + $0xb4] sm:$0xf]  ;;  %v734_v61 = vld [vmem:[#allocation8 + $0x24] sm:$0xf] }
  0x33   :  { %v678_v58 = vld [vmem:[#allocation8 + $0xb8] sm:$0xf0]  ;;  %v617_v59 = vor.u32 %v736_v55, %v614_v56  ;;  %v606_v62 = vld [vmem:[#allocation8 + $0x28] sm:$0xf0]  ;;  %v750_v63 = vld [vmem:[#allocation8 + $0xa4] sm:$0xf] }
  0x34   :  { %208 = vmatpush.bf16.msra.mxu0 %v525_v18  ;;  %v681_v60 = vor.u32 %v752_v57, %v678_v58  ;;  %v670_v0 = vld [vmem:[#allocation8 + $0xa8] sm:$0xf0]  ;;  %v609_v1 = vor.u32 %v734_v61, %v606_v62  ;;  %v732_v3 = vld [vmem:[#allocation8 + $0x14] sm:$0xf]  ;;  %v598_v4 = vld [vmem:[#allocation8 + $0x18] sm:$0xf0] }
  0x35   :  { %221 = vmatpush.bf16.msra.mxu1 %v529_v20  ;;  %432 = vmatpush.bf16.msra.mxu2 %v605_v33  ;;  %v673_v2 = vor.u32 %v750_v63, %v670_v0  ;;  %v748_v5 = vld [vmem:[#allocation8 + $0x94] sm:$0xf]  ;;  %v662_v6 = vld [vmem:[#allocation8 + $0x98] sm:$0xf0]  ;;  %v601_v7 = vor.u32 %v732_v3, %v598_v4  ;;  %v588_v9 = vld [vmem:[#allocation8] sm:$0xf] }
  0x36   :  { %445 = vmatpush.bf16.msra.mxu3 %v669_v41  ;;  %v665_v8 = vor.u32 %v748_v5, %v662_v6  ;;  %v731_v10 = vld [vmem:[#allocation8 + $0x4] sm:$0xf0]  ;;  %v652_v12 = vld [vmem:[#allocation8 + $0x80] sm:$0xf]  ;;  %v730_v14 = vld [vmem:[#allocation8 + $0x4] sm:$0xf] }
  0x37   :  { %209 = vmatmul.bf16.vlgmr.msra.gmra.mxu0 %v119_v32  ;;  %v589_v11 = vor.u32 %v731_v10, %v588_v9  ;;  %v747_v13 = vld [vmem:[#allocation8 + $0x84] sm:$0xf0]  ;;  %v590_v16 = vld [vmem:[#allocation8 + $0x8] sm:$0xf0]  ;;  %v746_v17 = vld [vmem:[#allocation8 + $0x84] sm:$0xf] }
  0x38   :  { %453 = vmatpush.bf16.msrb.mxu0 %v649_v21  ;;  %222 = vmatmul.bf16.vlgmr.msra.gmra.mxu1 %v119_v32  ;;  %v653_v15 = vor.u32 %v747_v13, %v652_v12  ;;  %v654_v18 = vld [vmem:[#allocation8 + $0x88] sm:$0xf0]  ;;  %v593_v19 = vor.u32 %v730_v14, %v590_v16  ;;  %v102_v21 = vld [vmem:[#allocation7] sm:$0x3]  ;;  %v261_v32 = vld [vmem:[%s964_s4] sm:$0x3] }
  0x39   :  { %466 = vmatpush.bf16.msrb.mxu1 %v713_v24  ;;  %433 = vmatpush.bf16.msra.mxu2 %v597_v45  ;;  %v657_v20 = vor.u32 %v746_v17, %v654_v18  ;;  %v104_v22 = vperm.slane %v102_v21, 0  ;;  %v105_v23 = vperm.slane %v102_v21, 1  ;;  %v264_v33 = vperm.slane %v261_v32, 1 }
  0x3a   :  { %446 = vmatpush.bf16.msra.mxu3 %v661_v50  ;;  %vm484_vm1 = vcmask 1043458   ;;  %vm487_vm2 = vcmask 1045508   ;;  %vm490_vm3 = vcmask 1045504  }
  0x3c   :  { %454 = vmatpush.bf16.msrb.mxu0 %v641_v34 }
  0x3d   :  { %467 = vmatpush.bf16.msrb.mxu1 %v705_v37  ;;  %434 = vmatpush.bf16.msra.mxu2 %v589_v11  ;;  %v263_v37 = vperm.slane %v261_v32, 0 }
  0x3e   :  { %447 = vmatpush.bf16.msra.mxu3 %v653_v15 }
  0x40   :  { %455 = vmatpush.bf16.msrb.mxu0 %v633_v46 }
  0x41   :  { %468 = vmatpush.bf16.msrb.mxu1 %v697_v47 }
  0x44   :  { %456 = vmatpush.bf16.msrb.mxu0 %v625_v53 }
  0x45   :  { %469 = vmatpush.bf16.msrb.mxu1 %v689_v54 }
  0x48   :  { %457 = vmatpush.bf16.msrb.mxu0 %v617_v59 }
  0x49   :  { %470 = vmatpush.bf16.msrb.mxu1 %v681_v60 }
  0x4c   :  { %458 = vmatpush.bf16.msrb.mxu0 %v609_v1 }
  0x4d   :  { %471 = vmatpush.bf16.msrb.mxu1 %v673_v2 }
  0x50   :  { %459 = vmatpush.bf16.msrb.mxu0 %v601_v7 }
  0x51   :  { %472 = vmatpush.bf16.msrb.mxu1 %v665_v8 }
  0x54   :  { %460 = vmatpush.bf16.msrb.mxu0 %v593_v19 }
  0x55   :  { %473 = vmatpush.bf16.msrb.mxu1 %v657_v20 }
  0xb4   :  { %v210_v24 = vpop.f32.mrf.mxu0 }
  0xb5   :  { %v211_v25 = vadd.f32 %v210_v24, %v104_v22  ;;  %v223_v26 = vpop.f32.mrf.mxu1 }
  0xb6   :  { %v224_v27 = vadd.f32 %v223_v26, %v105_v23 }
  0xb7   :  { %v227_v28 = vpack.c.bf16 %v211_v25, %v211_v25 }
  0xb8   :  { %v228_v29 = vpack.c.bf16 %v224_v27, %v224_v27 }
  0xb9   :  { %435 = vmatmul.bf16.vlgmr.msra.gmra.mxu2 %v227_v28  ;;  %461 = vmatmul.bf16.vlgmr.msrb.gmra.mxu0 %v227_v28 }
  0xba   :  { %448 = vmatmul.bf16.vlgmr.msra.gmra.mxu3 %v228_v29  ;;  %474 = vmatmul.bf16.vlgmr.msrb.gmra.mxu1 %v228_v29 }
  0xbc   :  { %v212_v30 = vpop.f32.mrf.mxu0 }
  0xbd   :  { %v225_v31 = vpop.f32.mrf.mxu1 }
 0x136   :  { %v462_v34 = vpop.f32.mrf.mxu0 }
 0x137   :  { %v463_v35 = vadd.f32 %v462_v34, %v264_v33  ;;  %v475_v36 = vpop.f32.mrf.mxu1 }
 0x139   :  { %v476_v38 = vadd.f32 %v475_v36, %v463_v35 }
 0x13b   :  { %v481_v43 = vrot.slane %v476_v38, 6 }
 0x13c   :  { %v436_v39 = vpop.f32.mrf.mxu2 }
 0x13d   :  { %v437_v40 = vadd.f32 %v436_v39, %v263_v37  ;;  %v449_v41 = vpop.f32.mrf.mxu3 }
 0x13e   :  { %v464_v42 = vpop.f32.mrf.mxu0 }
 0x13f   :  { %v450_v44 = vadd.f32 %v449_v41, %v437_v40  ;;  %v477_v45 = vpop.f32.mrf.mxu1 }
 0x141   :  { %v483_v46 = vsel %vm482_vm0, %v450_v44, %v481_v43  ;;  %v485_v47 = vsel %vm484_vm1, %v450_v44, %v481_v43  ;;  %v488_v48 = vsel %vm487_vm2, %v450_v44, %v481_v43  ;;  %v491_v49 = vsel %vm490_vm3, %v481_v43, %v450_v44 }
 0x142   :  { %v486_v50 = vrot.slane %v485_v47, 2  ;;  %v489_v51 = vrot.slane %v488_v48, 4  ;;  %v492_v52 = vrot.slane %v491_v49, 6  ;;  %497 = vst [vmem:[#allocation10] sm:$0xf] %v483_v46 }
 0x144   :  { %498 = vst [vmem:[#allocation10 + $0x4] sm:$0xf] %v486_v50  ;;  %v438_v53 = vpop.f32.mrf.mxu2 }
 0x145   :  { %499 = vst [vmem:[#allocation10 + $0x8] sm:$0xf] %v489_v51  ;;  %v451_v54 = vpop.f32.mrf.mxu3 }
 0x146   :  { %500 = vst [vmem:[#allocation10 + $0xc] sm:$0xf] %v492_v52 }
 0x147   :  { %504 = vsyncadd [#allocation4], 192  ;;  %s507_s16 = sshll.u32 %s965_s5, 4  ;;  %s909_s17 = smov [#allocation10]   ;;  %s508_s16 = int_to_ptr.hbm [resolvable:$true] %s507_s16 }
 0x148   :  { %s505_s18 = sshll.u32 %s909_s17, 4  ;;  %s910_s19 = smov 64   ;;  %s506_s18 = int_to_ptr.vmem [resolvable:$true] %s505_s18 }
 0x149   :  { %s911_s20 = smov 4  }
 0x14a   :  { %513 = dma.vmem_to_hbm [thread:$0]  %s506_s18, 64, %s508_s16, [#allocation4], %s910_s19, %s910_s19, %s911_s20  }
 0x14b   :  { %899 = dma.done.wait [#allocation4], 256  }
 0x14c   :  { %900 = vsyncadd [#allocation4], 4294967040 }
 0x14d   :  { %518 = vsyncpa [#allocation3], 1 }
 0x14e   :  { %519 = vsyncpa [#allocation6], 1 }
 0x14f   :  { %520 = vsyncpa [#allocation9], 1 }
 0x150   :  { %521 = vsyncpa [#allocation4], 1 }

</bundles_post_ra>
